<compile_context>
chip_gen: v7x
topology: tpu7x:2x2x1
jax: 0.10.0
libtpu: 0.0.40
codegen_flags: <defaults>
</compile_context>

<pallas_src>
import functools

import jax
import jax.numpy as jnp
from jax.experimental import pallas as pl
from jax.experimental.pallas import tpu as pltpu

IN_DIM = 28 * 28            # 784
H1, H2, H3 = 128, 64, 12
Z = 8


def _round_up(x, m):
    return (x + m - 1) // m * m


def _vae_kernel(
    x_ref, eps_ref,
    e1w_ref, e1b_ref, e2w_ref, e2b_ref,
    ezw_ref, ezb_ref,
    d1w_ref, d1b_ref, d2w_ref, d2b_ref, d3w_ref, d3b_ref,
    out_ref, mlv_ref,
):
    def lin(h, w_ref, b_ref):
        w = w_ref[...]
        # Cast activations to the weight dtype (bf16 for the big layers) and
        # accumulate on the MXU in f32.
        return jnp.dot(h.astype(w.dtype), w,
                       preferred_element_type=jnp.float32) + b_ref[...]

    x = x_ref[...]                                   # (TB, 784) bf16

    # Encoder: 784 -> 128 -> 64, ReLU between.
    h = jnp.maximum(lin(x, e1w_ref, e1b_ref), 0.0)   # (TB, 128) f32
    h = jnp.maximum(lin(h, e2w_ref, e2b_ref), 0.0)   # (TB, 64)  f32

    # Folded e3 + latent heads: exact 64 -> 16 matmul.
    # [:, :Z] = z_mean, [:, Z:] = z_log_var.
    mlv = lin(h, ezw_ref, ezb_ref)                   # (TB, 16) f32
    z_mean = mlv[:, :Z]
    z_log_var = mlv[:, Z:]

    # Reparameterization: z = mu + exp(logvar / 2) * eps
    latent = z_mean + jnp.exp(z_log_var * 0.5) * eps_ref[...]

    # Decoder: 8 -> 64 -> 128 -> 784, ReLU, ReLU, Sigmoid (EUP).
    d = jnp.maximum(lin(latent, d1w_ref, d1b_ref), 0.0)
    d = jnp.maximum(lin(d, d2w_ref, d2b_ref), 0.0)
    d = jax.nn.sigmoid(lin(d, d3w_ref, d3b_ref))     # (TB, 784) f32

    out_ref[...] = d.astype(out_ref.dtype)           # (TB, 784) bf16 store
    mlv_ref[...] = mlv.astype(mlv_ref.dtype)         # (TB, 16)  f32  store


@functools.partial(jax.jit, static_argnames=("block_b",))
def autoencoder_forward(x, eps, kparams, *, block_b=512):
    """x: (B, 784) bf16 (or castable), eps: (B, 8) f32,
    kparams: list from prepare_kernel_params.

    Returns (recon (B,784) bf16, z_mean (B,8) f32, z_log_var (B,8) f32)."""
    B = x.shape[0]

    # Batch tile: as large as allowed (<=1024), but keep >=2 grid steps when
    # the batch allows it so the "parallel" axis can use v7x's second core.
    B8 = _round_up(B, 8)
    TB = min(_round_up(min(block_b, 1024), 8), B8)
    if B8 >= 16 and TB > B8 // 2:
        TB = max(8, (B8 // 2) // 8 * 8)
    Bp = _round_up(B, TB)
    grid = (Bp // TB,)

    x_b = x.astype(jnp.bfloat16)
    eps_f = eps.astype(jnp.float32)
    if Bp != B:
        # Row pad only when TB does not divide B (avoided in the common case).
        x_b = jnp.pad(x_b, ((0, Bp - B), (0, 0)))
        eps_f = jnp.pad(eps_f, ((0, Bp - B), (0, 0)))

    def batch_spec(feat):
        return pl.BlockSpec((TB, feat), lambda i: (i, 0))

    # Weights/biases: whole array, constant block index -> resident in VMEM
    # across the entire batch grid (weight DMA amortized over the batch).
    weight_specs = [pl.BlockSpec(p.shape, lambda i: (0, 0)) for p in kparams]

    out_p, mlv_p = pl.pallas_call(
        _vae_kernel,
        out_shape=(
            jax.ShapeDtypeStruct((Bp, IN_DIM), jnp.bfloat16),
            jax.ShapeDtypeStruct((Bp, 2 * Z), jnp.float32),
        ),
        grid=grid,
        in_specs=[batch_spec(IN_DIM), batch_spec(Z)] + weight_specs,
        out_specs=(batch_spec(IN_DIM), batch_spec(2 * Z)),
        compiler_params=pltpu.CompilerParams(
            dimension_semantics=("parallel",),      # 2 TCs on v7x
            vmem_limit_bytes=48 * 1024 * 1024,
        ),
    )(x_b, eps_f, *kparams)

    if Bp != B:
        out_p = out_p[:B]
        mlv_p = mlv_p[:B]
    return out_p, mlv_p[:, :Z], mlv_p[:, Z:]


def init_linear(key, fan_in, fan_out):
    """PyTorch-style uniform(-1/sqrt(fan_in), 1/sqrt(fan_in)); W stored (in, out)."""
    kw, kb = jax.random.split(key)
    bound = 1.0 / jnp.sqrt(jnp.float32(fan_in))
    w = jax.random.uniform(kw, (fan_in, fan_out), jnp.float32, -bound, bound)
    b = jax.random.uniform(kb, (1, fan_out), jnp.float32, -bound, bound)
    return w, b


def init_params(key):
    """Flat f32 params in PyTorch layer order (W stored (in, out))."""
    dims = [
        (IN_DIM, H1), (H1, H2), (H2, H3),   # encoder
        (H3, Z), (H3, Z),                   # z_mean, z_log_var
        (Z, H2), (H2, H1), (H1, IN_DIM),    # decoder
    ]
    keys = jax.random.split(key, len(dims))
    params = []
    for k, (fi, fo) in zip(keys, dims):
        w, b = init_linear(k, fi, fo)
        params.extend([w, b])
    return params


def prepare_kernel_params(params):
    """f32 params -> kernel params: big weights bf16, e3+latent-heads folded."""
    (e1w, e1b, e2w, e2b, e3w, e3b,
     zmw, zmb, zvw, zvb,
     d1w, d1b, d2w, d2b, d3w, d3b) = params
    # Fuse the two latent heads, then fold e3 (no activation in between) into
    # them: mlv = (h2 @ e3w + e3b) @ zw + zb = h2 @ (e3w @ zw) + (e3b @ zw + zb)
    zw = jnp.concatenate([zmw, zvw], axis=1)         # (12, 16)
    zb = jnp.concatenate([zmb, zvb], axis=1)         # (1, 16)
    ezw = e3w @ zw                                   # (64, 16) f32, exact fold
    ezb = e3b @ zw + zb                              # (1, 16)  f32
    return [
        e1w.astype(jnp.bfloat16), e1b,               # (784, 128) bf16
        e2w.astype(jnp.bfloat16), e2b,               # (128, 64)  bf16
        ezw, ezb,                                    # (64, 16)   f32
        d1w, d1b,                                    # (8, 64)    f32
        d2w.astype(jnp.bfloat16), d2b,               # (64, 128)  bf16
        d3w.astype(jnp.bfloat16), d3b,               # (128, 784) bf16
    ]


def reference_forward_quant(x, eps, kparams):
    """Pure-JAX reference using the same (bf16-quantized, folded) params."""
    (e1w, e1b, e2w, e2b, ezw, ezb,
     d1w, d1b, d2w, d2b, d3w, d3b) = kparams

    def lin(h, w, b):
        return jnp.dot(h.astype(w.dtype), w,
                       preferred_element_type=jnp.float32) + b

    h = jnp.maximum(lin(x.astype(jnp.bfloat16), e1w, e1b), 0.0)
    h = jnp.maximum(lin(h, e2w, e2b), 0.0)
    mlv = lin(h, ezw, ezb)
    z_mean, z_log_var = mlv[:, :Z], mlv[:, Z:]
    latent = z_mean + jnp.exp(z_log_var * 0.5) * eps
    d = jnp.maximum(lin(latent, d1w, d1b), 0.0)
    d = jnp.maximum(lin(d, d2w, d2b), 0.0)
    d = jax.nn.sigmoid(lin(d, d3w, d3b))
    return d, z_mean, z_log_var


def reference_forward_f32(x, eps, params):
    """Full-precision reference matching the original PyTorch module exactly."""
    (e1w, e1b, e2w, e2b, e3w, e3b,
     zmw, zmb, zvw, zvb,
     d1w, d1b, d2w, d2b, d3w, d3b) = params

    def lin(h, w, b):
        return jnp.dot(h, w, preferred_element_type=jnp.float32) + b

    xf = x.astype(jnp.float32)
    h = jnp.maximum(lin(xf, e1w, e1b), 0.0)
    h = jnp.maximum(lin(h, e2w, e2b), 0.0)
    h = lin(h, e3w, e3b)
    z_mean = lin(h, zmw, zmb)
    z_log_var = lin(h, zvw, zvb)
    latent = z_mean + jnp.exp(z_log_var * 0.5) * eps
    d = jnp.maximum(lin(latent, d1w, d1b), 0.0)
    d = jnp.maximum(lin(d, d2w, d2b), 0.0)
    d = jax.nn.sigmoid(lin(d, d3w, d3b))
    return d, z_mean, z_log_var


if __name__ == "__main__":
    key = jax.random.PRNGKey(0)
    kx, keps, kparams_key = jax.random.split(key, 3)

    B = 32
    # Image-like input in [0,1); supplied to the kernel as bf16 (halved HBM I/O).
    x = jax.random.uniform(kx, (B, IN_DIM), jnp.float32).astype(jnp.bfloat16)
    eps = jax.random.normal(keps, (B, Z), jnp.float32)     # reparameterization noise
    params = init_params(kparams_key)
    kparams = prepare_kernel_params(params)

    # Default block_b=512; the >=2-grid-step cap makes this run 2 batch tiles
    # of 16 rows here, exercising the resident-weight / tiled-activation path.
    out, z_mean, z_log_var = jax.block_until_ready(
        autoencoder_forward(x, eps, kparams)
    )

    # Self-consistency vs. a reference built from the same bf16/folded params
    # (tolerance covers the bf16 output store, ~4e-3 absolute on [0,1]).
    ref_out, ref_mean, ref_lv = reference_forward_quant(x, eps, kparams)
    assert jnp.allclose(out.astype(jnp.float32), ref_out, atol=1.5e-2), \
        "decoder output mismatch (quantized ref)"
    assert jnp.allclose(z_mean, ref_mean, atol=1.5e-2), "z_mean mismatch (quantized ref)"
    assert jnp.allclose(z_log_var, ref_lv, atol=1.5e-2), "z_log_var mismatch (quantized ref)"

    # Faithfulness vs. the full f32 PyTorch-equivalent forward (looser tolerance
    # because e1/e2/d2/d3 weights and activation I/O are bf16 in the kernel).
    f32_out, f32_mean, f32_lv = reference_forward_f32(x, eps, params)
    assert jnp.allclose(out.astype(jnp.float32), f32_out, atol=5e-2), \
        "decoder output mismatch (f32 ref)"
    assert jnp.allclose(z_mean, f32_mean, atol=5e-2), "z_mean mismatch (f32 ref)"
    assert jnp.allclose(z_log_var, f32_lv, atol=5e-2), "z_log_var mismatch (f32 ref)"

    print("KERNEL_OK")
</pallas_src>

<mosaic_0001>
module attributes {stable_mosaic.version = 11 : i64} {
  func.func @_vae_kernel(%arg0: i32, %arg1: memref<16x784xbf16, #tpu.memory_space<vmem>>, %arg2: memref<16x8xf32, #tpu.memory_space<vmem>>, %arg3: memref<784x128xbf16, #tpu.memory_space<vmem>>, %arg4: memref<1x128xf32, #tpu.memory_space<vmem>>, %arg5: memref<128x64xbf16, #tpu.memory_space<vmem>>, %arg6: memref<1x64xf32, #tpu.memory_space<vmem>>, %arg7: memref<64x16xf32, #tpu.memory_space<vmem>>, %arg8: memref<1x16xf32, #tpu.memory_space<vmem>>, %arg9: memref<8x64xf32, #tpu.memory_space<vmem>>, %arg10: memref<1x64xf32, #tpu.memory_space<vmem>>, %arg11: memref<64x128xbf16, #tpu.memory_space<vmem>>, %arg12: memref<1x128xf32, #tpu.memory_space<vmem>>, %arg13: memref<128x784xbf16, #tpu.memory_space<vmem>>, %arg14: memref<1x784xf32, #tpu.memory_space<vmem>>, %arg15: memref<16x784xbf16, #tpu.memory_space<vmem>>, %arg16: memref<16x16xf32, #tpu.memory_space<vmem>>) attributes {dimension_semantics = [#tpu.dimension_semantics<parallel>], iteration_bounds = array<i64: 2>, scalar_prefetch = 0 : i64, scratch_operands = 0 : i64, tpu.core_type = #tpu.core_type<tc>, window_params = [{transform_indices = @transform_0, window_bounds = array<i64: 16, 784>}, {transform_indices = @transform_1, window_bounds = array<i64: 16, 8>}, {pipeline_mode = #tpu.pipeline_mode<synchronous>, transform_indices = @transform_2, window_bounds = array<i64: 784, 128>}, {pipeline_mode = #tpu.pipeline_mode<synchronous>, transform_indices = @transform_3, window_bounds = array<i64: 1, 128>}, {pipeline_mode = #tpu.pipeline_mode<synchronous>, transform_indices = @transform_4, window_bounds = array<i64: 128, 64>}, {pipeline_mode = #tpu.pipeline_mode<synchronous>, transform_indices = @transform_5, window_bounds = array<i64: 1, 64>}, {pipeline_mode = #tpu.pipeline_mode<synchronous>, transform_indices = @transform_6, window_bounds = array<i64: 64, 16>}, {pipeline_mode = #tpu.pipeline_mode<synchronous>, transform_indices = @transform_7, window_bounds = array<i64: 1, 16>}, {pipeline_mode = #tpu.pipeline_mode<synchronous>, transform_indices = @transform_8, window_bounds = array<i64: 8, 64>}, {pipeline_mode = #tpu.pipeline_mode<synchronous>, transform_indices = @transform_9, window_bounds = array<i64: 1, 64>}, {pipeline_mode = #tpu.pipeline_mode<synchronous>, transform_indices = @transform_10, window_bounds = array<i64: 64, 128>}, {pipeline_mode = #tpu.pipeline_mode<synchronous>, transform_indices = @transform_11, window_bounds = array<i64: 1, 128>}, {pipeline_mode = #tpu.pipeline_mode<synchronous>, transform_indices = @transform_12, window_bounds = array<i64: 128, 784>}, {pipeline_mode = #tpu.pipeline_mode<synchronous>, transform_indices = @transform_13, window_bounds = array<i64: 1, 784>}, {transform_indices = @transform_14, window_bounds = array<i64: 16, 784>}, {transform_indices = @transform_15, window_bounds = array<i64: 16, 16>}]} {
    %c0 = arith.constant 0 : index
    %c0_0 = arith.constant 0 : index
    %0 = vector.load %arg1[%c0, %c0_0] : memref<16x784xbf16, #tpu.memory_space<vmem>>, vector<16x784xbf16>
    %c0_1 = arith.constant 0 : index
    %c0_2 = arith.constant 0 : index
    %1 = vector.load %arg3[%c0_1, %c0_2] : memref<784x128xbf16, #tpu.memory_space<vmem>>, vector<784x128xbf16>
    %cst = arith.constant dense<0.000000e+00> : vector<16x128xf32>
    %2 = tpu.matmul %0, %1, %cst {dimension_numbers = #tpu.dot_dimension_numbers<[1], [0], [0], [1], [0, 0, 1, 1], [], []>} : vector<16x784xbf16>, vector<784x128xbf16>, vector<16x128xf32> -> vector<16x128xf32>
    %c0_3 = arith.constant 0 : index
    %c0_4 = arith.constant 0 : index
    %3 = vector.load %arg4[%c0_3, %c0_4] : memref<1x128xf32, #tpu.memory_space<vmem>>, vector<1x128xf32>
    %4 = vector.broadcast %3 : vector<1x128xf32> to vector<16x128xf32>
    %5 = arith.addf %2, %4 : vector<16x128xf32>
    %cst_5 = arith.constant 0.000000e+00 : f32
    %6 = vector.broadcast %cst_5 : f32 to vector<16x128xf32>
    %7 = arith.maximumf %5, %6 : vector<16x128xf32>
    %c0_6 = arith.constant 0 : index
    %c0_7 = arith.constant 0 : index
    %8 = vector.load %arg5[%c0_6, %c0_7] : memref<128x64xbf16, #tpu.memory_space<vmem>>, vector<128x64xbf16>
    %9 = arith.truncf %7 : vector<16x128xf32> to vector<16x128xbf16>
    %cst_8 = arith.constant dense<0.000000e+00> : vector<16x64xf32>
    %10 = tpu.matmul %9, %8, %cst_8 {dimension_numbers = #tpu.dot_dimension_numbers<[1], [0], [0], [1], [0, 0, 1, 1], [], []>} : vector<16x128xbf16>, vector<128x64xbf16>, vector<16x64xf32> -> vector<16x64xf32>
    %c0_9 = arith.constant 0 : index
    %c0_10 = arith.constant 0 : index
    %11 = vector.load %arg6[%c0_9, %c0_10] : memref<1x64xf32, #tpu.memory_space<vmem>>, vector<1x64xf32>
    %12 = vector.broadcast %11 : vector<1x64xf32> to vector<16x64xf32>
    %13 = arith.addf %10, %12 : vector<16x64xf32>
    %cst_11 = arith.constant 0.000000e+00 : f32
    %14 = vector.broadcast %cst_11 : f32 to vector<16x64xf32>
    %15 = arith.maximumf %13, %14 : vector<16x64xf32>
    %c0_12 = arith.constant 0 : index
    %c0_13 = arith.constant 0 : index
    %16 = vector.load %arg7[%c0_12, %c0_13] : memref<64x16xf32, #tpu.memory_space<vmem>>, vector<64x16xf32>
    %cst_14 = arith.constant dense<0.000000e+00> : vector<16x16xf32>
    %17 = tpu.matmul %15, %16, %cst_14 {dimension_numbers = #tpu.dot_dimension_numbers<[1], [0], [0], [1], [0, 0, 1, 1], [], []>} : vector<16x64xf32>, vector<64x16xf32>, vector<16x16xf32> -> vector<16x16xf32>
    %c0_15 = arith.constant 0 : index
    %c0_16 = arith.constant 0 : index
    %18 = vector.load %arg8[%c0_15, %c0_16] : memref<1x16xf32, #tpu.memory_space<vmem>>, vector<1x16xf32>
    %19 = vector.broadcast %18 : vector<1x16xf32> to vector<16x16xf32>
    %20 = arith.addf %17, %19 : vector<16x16xf32>
    %21 = vector.extract_strided_slice %20 {offsets = [0, 0], sizes = [16, 8], strides = [1, 1]} : vector<16x16xf32> to vector<16x8xf32>
    %22 = vector.extract_strided_slice %20 {offsets = [0, 8], sizes = [16, 8], strides = [1, 1]} : vector<16x16xf32> to vector<16x8xf32>
    %cst_17 = arith.constant 5.000000e-01 : f32
    %23 = vector.broadcast %cst_17 : f32 to vector<16x8xf32>
    %24 = arith.mulf %22, %23 : vector<16x8xf32>
    %25 = math.exp %24 : vector<16x8xf32>
    %c0_18 = arith.constant 0 : index
    %c0_19 = arith.constant 0 : index
    %26 = vector.load %arg2[%c0_18, %c0_19] : memref<16x8xf32, #tpu.memory_space<vmem>>, vector<16x8xf32>
    %27 = arith.mulf %25, %26 : vector<16x8xf32>
    %28 = arith.addf %21, %27 : vector<16x8xf32>
    %c0_20 = arith.constant 0 : index
    %c0_21 = arith.constant 0 : index
    %29 = vector.load %arg9[%c0_20, %c0_21] : memref<8x64xf32, #tpu.memory_space<vmem>>, vector<8x64xf32>
    %cst_22 = arith.constant dense<0.000000e+00> : vector<16x64xf32>
    %30 = tpu.matmul %28, %29, %cst_22 {dimension_numbers = #tpu.dot_dimension_numbers<[1], [0], [0], [1], [0, 0, 1, 1], [], []>} : vector<16x8xf32>, vector<8x64xf32>, vector<16x64xf32> -> vector<16x64xf32>
    %c0_23 = arith.constant 0 : index
    %c0_24 = arith.constant 0 : index
    %31 = vector.load %arg10[%c0_23, %c0_24] : memref<1x64xf32, #tpu.memory_space<vmem>>, vector<1x64xf32>
    %32 = vector.broadcast %31 : vector<1x64xf32> to vector<16x64xf32>
    %33 = arith.addf %30, %32 : vector<16x64xf32>
    %cst_25 = arith.constant 0.000000e+00 : f32
    %34 = vector.broadcast %cst_25 : f32 to vector<16x64xf32>
    %35 = arith.maximumf %33, %34 : vector<16x64xf32>
    %c0_26 = arith.constant 0 : index
    %c0_27 = arith.constant 0 : index
    %36 = vector.load %arg11[%c0_26, %c0_27] : memref<64x128xbf16, #tpu.memory_space<vmem>>, vector<64x128xbf16>
    %37 = arith.truncf %35 : vector<16x64xf32> to vector<16x64xbf16>
    %cst_28 = arith.constant dense<0.000000e+00> : vector<16x128xf32>
    %38 = tpu.matmul %37, %36, %cst_28 {dimension_numbers = #tpu.dot_dimension_numbers<[1], [0], [0], [1], [0, 0, 1, 1], [], []>} : vector<16x64xbf16>, vector<64x128xbf16>, vector<16x128xf32> -> vector<16x128xf32>
    %c0_29 = arith.constant 0 : index
    %c0_30 = arith.constant 0 : index
    %39 = vector.load %arg12[%c0_29, %c0_30] : memref<1x128xf32, #tpu.memory_space<vmem>>, vector<1x128xf32>
    %40 = vector.broadcast %39 : vector<1x128xf32> to vector<16x128xf32>
    %41 = arith.addf %38, %40 : vector<16x128xf32>
    %cst_31 = arith.constant 0.000000e+00 : f32
    %42 = vector.broadcast %cst_31 : f32 to vector<16x128xf32>
    %43 = arith.maximumf %41, %42 : vector<16x128xf32>
    %c0_32 = arith.constant 0 : index
    %c0_33 = arith.constant 0 : index
    %44 = vector.load %arg13[%c0_32, %c0_33] : memref<128x784xbf16, #tpu.memory_space<vmem>>, vector<128x784xbf16>
    %45 = arith.truncf %43 : vector<16x128xf32> to vector<16x128xbf16>
    %cst_34 = arith.constant dense<0.000000e+00> : vector<16x784xf32>
    %46 = tpu.matmul %45, %44, %cst_34 {dimension_numbers = #tpu.dot_dimension_numbers<[1], [0], [0], [1], [0, 0, 1, 1], [], []>} : vector<16x128xbf16>, vector<128x784xbf16>, vector<16x784xf32> -> vector<16x784xf32>
    %c0_35 = arith.constant 0 : index
    %c0_36 = arith.constant 0 : index
    %47 = vector.load %arg14[%c0_35, %c0_36] : memref<1x784xf32, #tpu.memory_space<vmem>>, vector<1x784xf32>
    %48 = vector.broadcast %47 : vector<1x784xf32> to vector<16x784xf32>
    %49 = arith.addf %46, %48 : vector<16x784xf32>
    %50 = arith.negf %49 : vector<16x784xf32>
    %51 = math.exp %50 : vector<16x784xf32>
    %cst_37 = arith.constant 1.000000e+00 : f32
    %52 = vector.broadcast %cst_37 : f32 to vector<16x784xf32>
    %53 = arith.addf %52, %51 : vector<16x784xf32>
    %54 = arith.divf %52, %53 : vector<16x784xf32>
    %55 = arith.truncf %54 : vector<16x784xf32> to vector<16x784xbf16>
    %c0_38 = arith.constant 0 : index
    %c0_39 = arith.constant 0 : index
    %56 = vector.load %arg15[%c0_38, %c0_39] : memref<16x784xbf16, #tpu.memory_space<vmem>>, vector<16x784xbf16>
    tpu.vector_store %arg15[%c0_38, %c0_39], %55 {strides = array<i32>} : memref<16x784xbf16, #tpu.memory_space<vmem>>, vector<16x784xbf16>,
    %c0_40 = arith.constant 0 : index
    %c0_41 = arith.constant 0 : index
    %57 = vector.load %arg16[%c0_40, %c0_41] : memref<16x16xf32, #tpu.memory_space<vmem>>, vector<16x16xf32>
    tpu.vector_store %arg16[%c0_40, %c0_41], %20 {strides = array<i32>} : memref<16x16xf32, #tpu.memory_space<vmem>>, vector<16x16xf32>,
    return
  }
  func.func @transform_0(%arg0: i32) -> (i32, i32) {
    %c0_i32 = arith.constant 0 : i32
    %c0_i32_0 = arith.constant 0 : i32
    return %arg0, %c0_i32 : i32, i32
  }
  func.func @transform_1(%arg0: i32) -> (i32, i32) {
    %c0_i32 = arith.constant 0 : i32
    %c0_i32_0 = arith.constant 0 : i32
    return %arg0, %c0_i32 : i32, i32
  }
  func.func @transform_2(%arg0: i32) -> (i32, i32) {
    %c0_i32 = arith.constant 0 : i32
    %c0_i32_0 = arith.constant 0 : i32
    %c0_i32_1 = arith.constant 0 : i32
    return %c0_i32, %c0_i32_0 : i32, i32
  }
  func.func @transform_3(%arg0: i32) -> (i32, i32) {
    %c0_i32 = arith.constant 0 : i32
    %c0_i32_0 = arith.constant 0 : i32
    %c0_i32_1 = arith.constant 0 : i32
    return %c0_i32, %c0_i32_0 : i32, i32
  }
  func.func @transform_4(%arg0: i32) -> (i32, i32) {
    %c0_i32 = arith.constant 0 : i32
    %c0_i32_0 = arith.constant 0 : i32
    %c0_i32_1 = arith.constant 0 : i32
    return %c0_i32, %c0_i32_0 : i32, i32
  }
  func.func @transform_5(%arg0: i32) -> (i32, i32) {
    %c0_i32 = arith.constant 0 : i32
    %c0_i32_0 = arith.constant 0 : i32
    %c0_i32_1 = arith.constant 0 : i32
    return %c0_i32, %c0_i32_0 : i32, i32
  }
  func.func @transform_6(%arg0: i32) -> (i32, i32) {
    %c0_i32 = arith.constant 0 : i32
    %c0_i32_0 = arith.constant 0 : i32
    %c0_i32_1 = arith.constant 0 : i32
    return %c0_i32, %c0_i32_0 : i32, i32
  }
  func.func @transform_7(%arg0: i32) -> (i32, i32) {
    %c0_i32 = arith.constant 0 : i32
    %c0_i32_0 = arith.constant 0 : i32
    %c0_i32_1 = arith.constant 0 : i32
    return %c0_i32, %c0_i32_0 : i32, i32
  }
  func.func @transform_8(%arg0: i32) -> (i32, i32) {
    %c0_i32 = arith.constant 0 : i32
    %c0_i32_0 = arith.constant 0 : i32
    %c0_i32_1 = arith.constant 0 : i32
    return %c0_i32, %c0_i32_0 : i32, i32
  }
  func.func @transform_9(%arg0: i32) -> (i32, i32) {
    %c0_i32 = arith.constant 0 : i32
    %c0_i32_0 = arith.constant 0 : i32
    %c0_i32_1 = arith.constant 0 : i32
    return %c0_i32, %c0_i32_0 : i32, i32
  }
  func.func @transform_10(%arg0: i32) -> (i32, i32) {
    %c0_i32 = arith.constant 0 : i32
    %c0_i32_0 = arith.constant 0 : i32
    %c0_i32_1 = arith.constant 0 : i32
    return %c0_i32, %c0_i32_0 : i32, i32
  }
  func.func @transform_11(%arg0: i32) -> (i32, i32) {
    %c0_i32 = arith.constant 0 : i32
    %c0_i32_0 = arith.constant 0 : i32
    %c0_i32_1 = arith.constant 0 : i32
    return %c0_i32, %c0_i32_0 : i32, i32
  }
  func.func @transform_12(%arg0: i32) -> (i32, i32) {
    %c0_i32 = arith.constant 0 : i32
    %c0_i32_0 = arith.constant 0 : i32
    %c0_i32_1 = arith.constant 0 : i32
    return %c0_i32, %c0_i32_0 : i32, i32
  }
  func.func @transform_13(%arg0: i32) -> (i32, i32) {
    %c0_i32 = arith.constant 0 : i32
    %c0_i32_0 = arith.constant 0 : i32
    %c0_i32_1 = arith.constant 0 : i32
    return %c0_i32, %c0_i32_0 : i32, i32
  }
  func.func @transform_14(%arg0: i32) -> (i32, i32) {
    %c0_i32 = arith.constant 0 : i32
    %c0_i32_0 = arith.constant 0 : i32
    return %arg0, %c0_i32 : i32, i32
  }
  func.func @transform_15(%arg0: i32) -> (i32, i32) {
    %c0_i32 = arith.constant 0 : i32
    %c0_i32_0 = arith.constant 0 : i32
    return %arg0, %c0_i32 : i32, i32
  }
}

</mosaic_0001>

<bundles_post_ra>
// kernel: autoencoder_forward.1
= control target key start
LH: loop header
LB: loop body
LE: loop exit
PB: predicated region body
PF: predicated region fallthrough
CT: control target
= control target key end

     0   :  { %21 = vsyncpa [#allocation3], 0  ;;  %s3767_s0 = inlined_call_operand.vmem [shape: bf16[32,784], index: 0, kind: input, shape index: {}]   ;;  %s3768_s1 = inlined_call_operand.vmem [shape: f32[32,8], index: 1, kind: input, shape index: {}]   ;;  %s3769_s2 = inlined_call_operand.vmem [shape: bf16[784,128], index: 2, kind: input, shape index: {}]   ;;  %s3770_s3 = inlined_call_operand.vmem [shape: f32[1,128], index: 3, kind: input, shape index: {}]   ;;  %s3771_s4 = inlined_call_operand.vmem [shape: bf16[128,64], index: 4, kind: input, shape index: {}]   ;;  %s3772_s5 = inlined_call_operand.vmem [shape: f32[1,64], index: 5, kind: input, shape index: {}]   ;;  %s3773_s6 = inlined_call_operand.vmem [shape: f32[64,16], index: 6, kind: input, shape index: {}]   ;;  %s3774_s7 = inlined_call_operand.vmem [shape: f32[1,16], index: 7, kind: input, shape index: {}]   ;;  %s3775_s8 = inlined_call_operand.vmem [shape: f32[8,64], index: 8, kind: input, shape index: {}]   ;;  %s3776_s9 = inlined_call_operand.vmem [shape: f32[1,64], index: 9, kind: input, shape index: {}]   ;;  %s3777_s10 = inlined_call_operand.vmem [shape: bf16[64,128], index: 10, kind: input, shape index: {}]   ;;  %s3778_s11 = inlined_call_operand.vmem [shape: f32[1,128], index: 11, kind: input, shape index: {}]   ;;  %s3779_s12 = inlined_call_operand.vmem [shape: bf16[128,784], index: 12, kind: input, shape index: {}]   ;;  %s3780_s13 = inlined_call_operand.vmem [shape: f32[1,784], index: 13, kind: input, shape index: {}]   ;;  %s3781_s14 = inlined_call_operand.hbm [shape: bf16[32,784], index: 14, kind: output, shape index: {0}]   ;;  %s3782_s15 = inlined_call_operand.vmem [shape: f32[32,16], index: 15, kind: output, shape index: {1}]  }
   0x1   :  { %23 = vsyncpa [#allocation3 + $0x1], 0  ;;  %s3182_s18 = smov 0   ;;  %s3184_s19 = smov 0  }
   0x2   :  { %s3186_s20 = smov 0   ;;  %s3188_s21 = smov 0  }
   0x3 LB: > { %3789 = sst [smem:[#allocation5_spill]] %s3080_s18  ;;  %s3203_s22 = sadd.s32 4294967295, %s3092_s21   ;;  %s3092_s21 = sphi %s3188_s21, %s3800_s21   ;;  %s3088_s20 = sphi %s3186_s20, %s3802_s20   ;;  %s3084_s19 = sphi %s3184_s19, %s3804_s19   ;;  %s3080_s18 = sphi %s3182_s18, %s3803_s18  }
   0x4   : > { %3790 = sst [smem:[#allocation6_spill]] %s3088_s20  ;;  %s2388_s23 = sadd.s32 4294967294, %s3092_s21  }
   0x5   : > { %3791 = sst [smem:[#allocation7_spill]] %s3092_s21  ;;  %s3207_s24 = sadd.s32 1, %s3092_s21  }
   0x6   : > { %3792 = sst [smem:[#allocation8_spill]] %s3207_s24  ;;  %s340_s25 = sadd.s32 1, %s3088_s20 }
   0x7   : > { %s337_s26 = ssub.s32 %s3092_s21, %s3207_s24  ;;  %p350_p0 = scmp.ne.s32.totalorder %s3088_s20, %s3084_s19 }
   0x8   : > { %p338_p1 = scmp.eq.s32.totalorder %s337_s26, 0  ;;  %p351_p2 = scmp.eq.s32.totalorder %s3203_s22, 1 }
   0x9   : > { %p356_p3 = scmp.ne.s32.totalorder %s3084_s19, %s3080_s18  ;;  %p357_p4 = scmp.eq.s32.totalorder %s2388_s23, 1 }
   0xa   : > { %s3218_s27 = scalar_select %p338_p1, %s3088_s20, %s340_s25  }
   0xb   : > { %p3220_p5 = por %p351_p2, %p350_p0  ;;  %p3224_p6 = por %p357_p4, %p356_p3 }
   0xc   : > { %3793 = sst [smem:[#allocation9_spill]] %s3218_s27  ;;  %p2391_p7 = scmp.ge.s32.totalorder %s3092_s21, 1 }
   0xd   : > { %s3795_s29 = scalar_select %p3224_p6, 1, 0 }
   0xe   : > { %p456_p8 = scmp.lt.s32.totalorder %s3092_s21, 3 }
   0xf   : > { %3796 = sst [smem:[#allocation10_spill]] %s3795_s29 }
  0x10   : > { %p457_p9 = pnand %p2391_p7, %p456_p8 }
  0x11   : > { %v2819_v0 = vld [vmem:[%s3769_s2 + $0x40] sm:$0xff] (!%p457_p9)   ;;  %v2823_v4 = vld [vmem:[%s3769_s2 + $0x48] sm:$0xff] (!%p457_p9)   ;;  %v2827_v8 = vld [vmem:[%s3769_s2 + $0x50] sm:$0xff] (!%p457_p9)   ;;  %s2392_s29 = sshll.u32 (!%p457_p9), %s3203_s22, 1  ;;  %v3094_v38 = vmov (!%p457_p9), 0.0   ;;  %vm3095_vm0 = vmmov (!%p457_p9), 0  }
  0x12   : > { %460 = sbr.rel (%p457_p9) target bundleno = 1614 (0x64e), region = 76  ;;  %v2820_v1 = vld [vmem:[%s3769_s2] sm:$0xff] (!%p457_p9)   ;;  %2568 = vmatprep.subr.bf16.mxu0 (!%p457_p9), %v2819_v0  ;;  %v2824_v5 = vld [vmem:[%s3769_s2 + $0x8] sm:$0xff] (!%p457_p9)   ;;  %v2828_v9 = vld [vmem:[%s3769_s2 + $0x10] sm:$0xff] (!%p457_p9)   ;;  %p516_p10 = scmp.lt.s32.totalorder (!%p457_p9), %s2392_s29, 3  ;;  %vm978_vm1 = vcmask (!%p457_p9), 130048  }
  0x13   : > { %v2821_v2 = vld [vmem:[%s3769_s2 + $0xc0] sm:$0xff] (!%p457_p9)   ;;  %2569 = vmatpush3.bf16.msra.mxu0 (!%p457_p9), %v2820_v1  ;;  %v2825_v6 = vld [vmem:[%s3769_s2 + $0xc8] sm:$0xff] (!%p457_p9)   ;;  %v2829_v10 = vld [vmem:[%s3769_s2 + $0xd0] sm:$0xff] (!%p457_p9)   ;;  %s3096_s21 = smov (!%p457_p9), 8   ;;  %vm1278_vm2 = vcmask (!%p457_p9), 523264   ;;  %s3097_s26 = smov (!%p457_p9), 120  }
  0x14   : > { %v2822_v3 = vld [vmem:[%s3769_s2 + $0x80] sm:$0xff] (!%p457_p9)   ;;  %2590 = vmatprep.subr.bf16.mxu1 (!%p457_p9), %v2821_v2  ;;  %2570 = vmatprep.subr.bf16.mxu0 (!%p457_p9), %v2823_v4  ;;  %v2826_v7 = vld [vmem:[%s3769_s2 + $0x88] sm:$0xff] (!%p457_p9)   ;;  %v2830_v11 = vld [vmem:[%s3769_s2 + $0x90] sm:$0xff] (!%p457_p9)   ;;  %vm1396_vm3 = vcmask (!%p457_p9), 64512   ;;  %s505_s16 = sand.u32 (!%p457_p9), 1, %s3084_s19   ;;  %vm2257_vm4 = vcmask (!%p457_p9), 125952  }
  0x15   : > { %2591 = vmatpush3.bf16.msra.mxu1 (!%p457_p9), %v2822_v3  ;;  %v2831_v12 = vld [vmem:[%s3769_s2 + $0x58] sm:$0xff] (!%p457_p9)   ;;  %v2835_v16 = vld [vmem:[%s3769_s2 + $0x60] sm:$0xff] (!%p457_p9)   ;;  %v2839_v20 = vld [vmem:[%s3769_s2 + $0x68] sm:$0xff] (!%p457_p9)   ;;  %s2770_s17 = smul.u32 (!%p457_p9), 56, %s505_s16 }
  0x16   : > { %2592 = vmatprep.subr.bf16.mxu1 (!%p457_p9), %v2825_v6  ;;  %v2832_v13 = vld [vmem:[%s3769_s2 + $0x18] sm:$0xff] (!%p457_p9)   ;;  %v2836_v17 = vld [vmem:[%s3769_s2 + $0x20] sm:$0xff] (!%p457_p9)   ;;  %v2840_v21 = vld [vmem:[%s3769_s2 + $0x28] sm:$0xff] (!%p457_p9)   ;;  %s2772_s27 = smul.u32 (!%p457_p9), 896, %s3203_s22  ;;  %s3726_s22 = scalar_lea.sflag (!%p457_p9), [#allocation3], %s505_s16 }
  0x17   : > { %2571 = vmatpush3.bf16.msra.mxu0 (!%p457_p9), %v2824_v5  ;;  %v2833_v14 = vld [vmem:[%s3769_s2 + $0xd8] sm:$0xff] (!%p457_p9)   ;;  %v2837_v18 = vld [vmem:[%s3769_s2 + $0xe0] sm:$0xff] (!%p457_p9)   ;;  %v2841_v22 = vld [vmem:[%s3769_s2 + $0xe8] sm:$0xff] (!%p457_p9)  }
  0x18   : > { %2572 = vmatprep.subr.bf16.mxu0 (!%p457_p9), %v2827_v8  ;;  %v2834_v15 = vld [vmem:[%s3769_s2 + $0x98] sm:$0xff] (!%p457_p9)   ;;  %v2838_v19 = vld [vmem:[%s3769_s2 + $0xa0] sm:$0xff] (!%p457_p9)   ;;  %v2842_v23 = vld [vmem:[%s3769_s2 + $0xa8] sm:$0xff] (!%p457_p9)  }
  0x19   : > { %2593 = vmatpush3.bf16.msra.mxu1 %v2826_v7  ;;  %s3806_s29 = smov (!%p516_p10, %s2392_s29), 3  ;;  %v2843_v24 = vld [vmem:[%s3769_s2 + $0x70] sm:$0xff]   ;;  %v2847_v28 = vld [vmem:[%s3769_s2 + $0x78] sm:$0xff]   ;;  %v2854_v34 = vld [vmem:[%s3769_s2 + $0x140] sm:$0xff]  }
  0x1a   : > { %2594 = vmatprep.subr.bf16.mxu1 %v2829_v10  ;;  %s2771_s23 = smul.u32 28, %s3806_s29  ;;  %v2844_v25 = vld [vmem:[%s3769_s2 + $0x30] sm:$0xff]   ;;  %v2848_v29 = vld [vmem:[%s3769_s2 + $0x38] sm:$0xff]   ;;  %v2858_v37 = vld [vmem:[%s3769_s2 + $0x100] sm:$0xff]   ;;  %s2395_s20 = sshll.u32 %s3806_s29, 3 }
  0x1b   : > { %2573 = vmatpush3.bf16.msra.mxu0 %v2828_v9  ;;  %v2845_v26 = vld [vmem:[%s3769_s2 + $0xf0] sm:$0xff]   ;;  %v2849_v30 = vld [vmem:[%s3769_s2 + $0xf8] sm:$0xff]   ;;  %v2859_v39 = vld [vmem:[%s3769_s2 + $0x148] sm:$0xff]   ;;  %s533_s25 = scalar_lea.vmem %s3782_s15, %s2395_s20 }
  0x1c   : > { %2574 = vmatprep.subr.bf16.mxu0 %v2831_v12  ;;  %v2846_v27 = vld [vmem:[%s3769_s2 + $0xb0] sm:$0xff]   ;;  %s3324_s18 = scalar_lea.vmem %s3767_s0, %s2771_s23  ;;  %v2853_v33 = vld [vmem:[%s3769_s2 + $0xb8] sm:$0xff]   ;;  %v2860_v40 = vld [vmem:[%s3769_s2 + $0x108] sm:$0xff]  }
  0x1d   : > { %2595 = vmatpush3.bf16.msra.mxu1 %v2830_v11  ;;  %v2850_v31 = vld [vmem:[%s3324_s18] ss:$28 sps:$4 sm:$0xff]   ;;  %v2855_v35 = vld [vmem:[%s3324_s18 + $0x8] ss:$28 sps:$4 sm:$0xff]   ;;  %v2861_v41 = vld [vmem:[%s3769_s2 + $0x150] sm:$0xff]  }
  0x1e   : > { %2596 = vmatprep.subr.bf16.mxu1 %v2833_v14  ;;  %v2852_v32 = vld [vmem:[%s3324_s18 + $0x4] ss:$28 sps:$4 sm:$0xff]   ;;  %v2857_v36 = vld [vmem:[%s3324_s18 + $0xc] ss:$28 sps:$4 sm:$0xff]   ;;  %v2862_v42 = vld [vmem:[%s3769_s2 + $0x110] sm:$0xff]  }
  0x1f   : > { %2575 = vmatpush3.bf16.msra.mxu0 %v2832_v13  ;;  %1014 = vmatprep.mubr.bf16.mxu0 %v2852_v32  ;;  %v2863_v43 = vld [vmem:[%s3769_s2 + $0x158] sm:$0xff]   ;;  %v2865_v45 = vld [vmem:[%s3769_s2 + $0x160] sm:$0xff]   ;;  %v2867_v47 = vld [vmem:[%s3769_s2 + $0x168] sm:$0xff]  }
  0x20   : > { %2576 = vmatprep.subr.bf16.mxu0 %v2835_v16  ;;  %1055 = vmatprep.mubr.bf16.mxu1 %v2857_v36  ;;  %v2864_v44 = vld [vmem:[%s3769_s2 + $0x118] sm:$0xff]   ;;  %v2866_v46 = vld [vmem:[%s3769_s2 + $0x120] sm:$0xff]   ;;  %v2875_v48 = vld [vmem:[%s3324_s18 + $0x14] ss:$28 sps:$4 sm:$0xff]  }
  0x21   : > { %2597 = vmatpush3.bf16.msra.mxu1 %v2834_v15  ;;  %v2868_v49 = vld [vmem:[%s3769_s2 + $0x128] sm:$0xff]   ;;  %v2869_v50 = vld [vmem:[%s3769_s2 + $0x170] sm:$0xff]   ;;  %v2871_v52 = vld [vmem:[%s3769_s2 + $0x178] sm:$0xff]  }
  0x22   : > { %2598 = vmatprep.subr.bf16.mxu1 %v2837_v18  ;;  %v2870_v51 = vld [vmem:[%s3769_s2 + $0x130] sm:$0xff]   ;;  %v2872_v53 = vld [vmem:[%s3769_s2 + $0x138] sm:$0xff]   ;;  %v2876_v55 = vld [vmem:[%s3769_s2 + $0x180] sm:$0xff]  }
  0x23   : > { %2577 = vmatpush3.bf16.msra.mxu0 %v2836_v17  ;;  %v2873_v54 = vld [vmem:[%s3324_s18 + $0x10] ss:$28 sps:$4 sm:$0xff]   ;;  %v2877_v56 = vld [vmem:[%s3324_s18 + $0x18] ss:$28 sps:$4 sm:$0xff]   ;;  %v2878_v57 = vld [vmem:[%s3771_s4] sm:$0xff]   ;;  %s526_s18 = scalar_lea.vmem %s3768_s1, %s2395_s20 }
  0x24   : > { %2578 = vmatprep.subr.bf16.mxu0 %v2839_v20  ;;  %v2879_v58 = vld [vmem:[%s3771_s4 + $0x8] sm:$0xff]   ;;  %v2880_v59 = vld [vmem:[%s3771_s4 + $0x10] sm:$0xff]   ;;  %v2881_v60 = vld [vmem:[%s3771_s4 + $0x18] sm:$0xff]  }
  0x25   : > { %2599 = vmatpush3.bf16.msra.mxu1 %v2838_v19  ;;  %v2882_v61 = vld [vmem:[%s3771_s4 + $0x20] sm:$0xff]   ;;  %v2883_v62 = vld [vmem:[%s3771_s4 + $0x28] sm:$0xff]   ;;  %v2884_v63 = vld [vmem:[%s3771_s4 + $0x30] sm:$0xff]  }
  0x26   : > { %2600 = vmatprep.subr.bf16.mxu1 %v2841_v22  ;;  %v2885_v0 = vld [vmem:[%s3771_s4 + $0x38] sm:$0xff]   ;;  %v1263_v1 = vld [vmem:[%s3773_s6] sm:$0xff]  ;;  %v1264_v2 = vld [vmem:[%s3773_s6 + $0x8] sm:$0xff] }
  0x27   : > { %2579 = vmatpush3.bf16.msra.mxu0 %v2840_v21  ;;  %v2754_v3 = vpack.c.bf16 %v1264_v2, %v1263_v1  ;;  %v2398_v5 = vld [vmem:[%s3770_s3] ss:$0 sm:$0xff]  ;;  %v1266_v36 = vld [vmem:[%s3773_s6 + $0x18] sm:$0xff] }
  0x28   : > { %2580 = vmatprep.subr.bf16.mxu0 %v2843_v24 }
  0x29   : > { %2601 = vmatpush3.bf16.msra.mxu1 %v2842_v23 }
  0x2a   : > { %2602 = vmatprep.subr.bf16.mxu1 %v2845_v26 }
  0x2b   : > { %2581 = vmatpush3.bf16.msra.mxu0 %v2844_v25 }
  0x2c   : > { %2582 = vmatprep.subr.bf16.mxu0 %v2847_v28 }
  0x2d   : > { %2603 = vmatpush3.bf16.msra.mxu1 %v2846_v27 }
  0x2e   : > { %2604 = vmatprep.subr.bf16.mxu1 %v2849_v30 }
  0x2f   : > { %2583 = vmatpush3.bf16.msra.mxu0 %v2848_v29 }
  0x30   : > { %2612 = vmatprep.subr.bf16.mxu0 %v2854_v34 }
  0x31   : > { %2605 = vmatpush3.bf16.msra.mxu1 %v2853_v33 }
  0x32   : > { %1015 = vmatmul.mubr.bf16.vlgmr.msra.gmra.mrb[0].mxu0 %v2850_v31  ;;  %2678 = vmatprep.subr.bf16.mxu1 %v3094_v38 }
  0x33   : > { %2613 = vmatpush3.bf16.msra.mxu0 %v2858_v37  ;;  %1096 = vmatprep.mubr.bf16.mxu0 %v2875_v48  ;;  %v1366_v48 = vld [vmem:[%s526_s18] sm:$0xff] }
  0x34   : > { %1056 = vmatmul.mubr.bf16.vlgmr.msra.gmra.mrb[0].mxu1 %v2855_v35  ;;  %2614 = vmatprep.subr.bf16.mxu0 %v2859_v39  ;;  %v1265_v35 = vld [vmem:[%s3773_s6 + $0x10] sm:$0xff] }
  0x35   : > { %2694 = vmatprep.mubr.msk.bf16.mxu1 %vm3095_vm0, %v3094_v38  ;;  %2679 = vmatpush3.bf16.msra.mxu1 %v2878_v57 }
  0x36   : > { %2680 = vmatprep.subr.bf16.mxu1 %v3094_v38  ;;  %1370 = vrot.lane.b32.xlu0 %v1366_v48, %s3096_s21  ;;  %v2919_v48 = vld [vmem:[%s3779_s12 + $0xec] ss:$28 sps:$4 sm:$0xff]  }
  0x37   : > { %2615 = vmatpush3.bf16.msra.mxu0 %v2860_v40 }
  0x38   : > { %2616 = vmatprep.subr.bf16.mxu0 %v2861_v41  ;;  %v2758_v41 = vpack.c.bf16 %v1266_v36, %v1265_v35 }
  0x39   : > { %2681 = vmatpush3.bf16.msra.mxu1 %v2879_v58 }
  0x3a   : > { %2682 = vmatprep.subr.bf16.mxu1 %v3094_v38 }
  0x3b   : > { %2617 = vmatpush3.bf16.msra.mxu0 %v2862_v42  ;;  %v1267_v42 = vld [vmem:[%s3773_s6 + $0x20] sm:$0xff] }
  0x3c   : > { %2618 = vmatprep.subr.bf16.mxu0 %v2863_v43  ;;  %v1268_v43 = vld [vmem:[%s3773_s6 + $0x28] sm:$0xff] }
  0x3d   : > { %2683 = vmatpush3.bf16.msra.mxu1 %v2880_v59  ;;  %v2465_v59 = vld [vmem:[%s3774_s7] ss:$0 sm:$0xff] }
  0x3e   : > { %2684 = vmatprep.subr.bf16.mxu1 %v3094_v38 }
  0x3f   : > { %2619 = vmatpush3.bf16.msra.mxu0 %v2864_v44  ;;  %v2762_v44 = vpack.c.bf16 %v1268_v43, %v1267_v42  ;;  %v2901_v42 = vld [vmem:[%s3779_s12 + $0x44] ss:$28 sps:$4 sm:$0xff]  }
  0x40   : > { %2620 = vmatprep.subr.bf16.mxu0 %v2865_v45  ;;  %v1269_v45 = vld [vmem:[%s3773_s6 + $0x30] sm:$0xff]  ;;  %v2899_v43 = vld [vmem:[%s3779_s12 + $0x40] ss:$28 sps:$4 sm:$0xff]  }
  0x41   : > { %2685 = vmatpush3.bf16.msra.mxu1 %v2881_v60 }
  0x42   : > { %2686 = vmatprep.subr.bf16.mxu1 %v3094_v38 }
  0x43   : > { %2621 = vmatpush3.bf16.msra.mxu0 %v2866_v46  ;;  %v1270_v46 = vld [vmem:[%s3773_s6 + $0x38] sm:$0xff] }
  0x44   : > { %2622 = vmatprep.subr.bf16.mxu0 %v2867_v47  ;;  %v2766_v47 = vpack.c.bf16 %v1270_v46, %v1269_v45  ;;  %v2905_v45 = vld [vmem:[%s3779_s12 + $0x78] ss:$28 sps:$4 sm:$0xff]  }
  0x45   : > { %2687 = vmatpush3.bf16.msra.mxu1 %v2882_v61  ;;  %v2913_v46 = vld [vmem:[%s3779_s12 + $0xb4] ss:$28 sps:$4 sm:$0xff]  }
  0x46   : > { %2688 = vmatprep.subr.bf16.mxu1 %v3094_v38 }
  0x47   : > { %2623 = vmatpush3.bf16.msra.mxu0 %v2868_v49  ;;  %v1367_v49 = vld [vmem:[%s526_s18 + $0x8] sm:$0xff] }
  0x48   : > { %2624 = vmatprep.subr.bf16.mxu0 %v2869_v50  ;;  %1372 = vrot.lane.b32.xlu0 %v1367_v49, %s3096_s21  ;;  %v2456_v50 = vld [vmem:[%s3772_s5] ss:$0 sm:$0xff]  ;;  %v2917_v49 = vld [vmem:[%s3779_s12 + $0xe8] ss:$28 sps:$4 sm:$0xff]   ;;  %s3718_s21 = scalar_lea.hbm %s3781_s14, %s2772_s27 }
  0x49   : > { %2689 = vmatpush3.bf16.msra.mxu1 %v2883_v62 }
  0x4a   : > { %2690 = vmatprep.subr.bf16.mxu1 %v3094_v38 }
  0x4b   : > { %2625 = vmatpush3.bf16.msra.mxu0 %v2870_v51 }
  0x4c   : > { %2626 = vmatprep.subr.bf16.mxu0 %v2871_v52 }
  0x4d   : > { %2691 = vmatpush3.bf16.msra.mxu1 %v2884_v63 }
  0x4e   : > { %2692 = vmatprep.subr.bf16.mxu1 %v3094_v38 }
  0x4f   : > { %2627 = vmatpush3.bf16.msra.mxu0 %v2872_v53 }
  0x50   : > { %2672 = vmatprep.subr.bf16.mxu0 %v3094_v38 }
  0x51   : > { %2693 = vmatpush3.bf16.msra.mxu1 %v2885_v0 }
  0x52   : > { %1097 = vmatmul.mubr.bf16.vlgmr.msra.gmra.mrb[4].mxu0 %v2873_v54  ;;  %2755 = vmatprep.subr.bf16.mxu1 %v2754_v3 }
  0x53   : > { %2673 = vmatpush3.bf16.msra.mxu0 %v2876_v55  ;;  %2674 = vmatprep.mubr.msk.bf16.mxu0 %vm3095_vm0, %v3094_v38 }
  0x54   : > { %2722 = vmatprep.subr.bf16.mxu0 %v3094_v38 }
  0x5a   : > { %2675 = vmatmul.mubr.msk.bf16.vlgmr.msra.gmra.mrb[8].mxu0 %vm978_vm1, %v2877_v56 }
  0x5b   : > { %2730 = vmatprep.mubr.msk.bf16.mxu0 %vm3095_vm0, %v3094_v38 }
 0x105   : > { %v2584_v4 = vpop.f32.mrb[0].mxu0 }
 0x106   : > { %v2585_v6 = vpop.f32.mrb[1].mxu0 }
 0x107   : > { %v2586_v7 = vadd.f32 %v2585_v6, %v2584_v4  ;;  %v2587_v8 = vpop.f32.mrb[2].mxu0  ;;  %v2606_v9 = vpop.f32.mrb[0].mxu1  ;;  %v1388_v4 = vld [vmem:[%s3775_s8] sm:$0xff] }
 0x108   : > { %v2588_v10 = vpop.f32.mrb[3].mxu0  ;;  %v2607_v13 = vpop.f32.mrb[1].mxu1  ;;  %v2886_v6 = vld [vmem:[%s3777_s10] sm:$0xff]  }
 0x109   : > { %v1017_v11 = vadd.f32 %v2586_v7, %v2398_v5  ;;  %v2589_v12 = vadd.f32 %v2588_v10, %v2587_v8  ;;  %v2608_v14 = vadd.f32 %v2607_v13, %v2606_v9  ;;  %v2609_v15 = vpop.f32.mrb[2].mxu1  ;;  %2723 = vmatpush3.bf16.msra.mxu0 %v2886_v6  ;;  %v2887_v7 = vld [vmem:[%s3777_s10 + $0x8] sm:$0xff]  }
 0x10a   : > { %v2610_v17 = vpop.f32.mrb[3].mxu1  ;;  %2724 = vmatprep.subr.bf16.mxu0 %v3094_v38 }
 0x10b   : > { %v1020_v16 = vadd.f32 %v2589_v12, %v2398_v5  ;;  %v1058_v18 = vadd.f32 %v2608_v14, %v1017_v11  ;;  %v2611_v19 = vadd.f32 %v2610_v17, %v2609_v15  ;;  %v1371_v5 = vpop.permute.xlu0 %1370  ;;  %v2888_v17 = vld [vmem:[%s3777_s10 + $0x10] sm:$0xff]  }
 0x10d   : > { %v1061_v20 = vadd.f32 %v2611_v19, %v1020_v16  ;;  %2725 = vmatpush3.bf16.msra.mxu0 %v2887_v7  ;;  %v2890_v19 = vld [vmem:[%s3779_s12] ss:$28 sps:$4 sm:$0xff]   ;;  %v2938_v7 = vld [vmem:[%s3779_s12 + $0x10] ss:$28 sps:$4 sm:$0xff]  }
 0x10e   : > { %2726 = vmatprep.subr.bf16.mxu0 %v3094_v38 }
 0x10f   : > { %v1373_v11 = vpop.permute.xlu0 %1372 }
 0x111   : > { %2727 = vmatpush3.bf16.msra.mxu0 %v2888_v17  ;;  %v2950_v17 = vld [vmem:[%s3779_s12 + $0xb8] ss:$28 sps:$4 sm:$0xff]  }
 0x112   : > { %2728 = vmatprep.subr.bf16.mxu0 %v3094_v38 }
 0x125   : > { %v2628_v21 = vpop.f32.mrb[4].mxu0 }
 0x126   : > { %v2629_v22 = vpop.f32.mrb[5].mxu0 }
 0x127   : > { %v2630_v23 = vadd.f32 %v2629_v22, %v2628_v21  ;;  %v2631_v24 = vpop.f32.mrb[6].mxu0  ;;  %v2895_v21 = vld [vmem:[%s3779_s12 + $0xc] ss:$28 sps:$4 sm:$0xff]   ;;  %v2898_v22 = vld [vmem:[%s3779_s12 + $0x3c] ss:$28 sps:$4 sm:$0xff]  }
 0x128   : > { %v2632_v25 = vpop.f32.mrb[7].mxu0 }
 0x129   : > { %v2633_v26 = vadd.f32 %v2632_v25, %v2631_v24  ;;  %v1099_v27 = vadd.f32 %v2630_v23, %v1058_v18  ;;  %v2889_v18 = vld [vmem:[%s3777_s10 + $0x18] sm:$0xff]   ;;  %v2904_v24 = vld [vmem:[%s3779_s12 + $0x74] ss:$28 sps:$4 sm:$0xff]  }
 0x12a   : > { %2729 = vmatpush3.bf16.msra.mxu0 %v2889_v18  ;;  %v2896_v23 = vld [vmem:[%s3779_s12 + $0x38] ss:$28 sps:$4 sm:$0xff]   ;;  %v2902_v25 = vld [vmem:[%s3779_s12 + $0x70] ss:$28 sps:$4 sm:$0xff]   ;;  %v2953_v18 = vld [vmem:[%s3779_s12 + $0xc0] ss:$28 sps:$4 sm:$0xff]  }
 0x12b   : > { %v1102_v28 = vadd.f32 %v2633_v26, %v1061_v20  ;;  %v2892_v20 = vld [vmem:[%s3779_s12 + $0x4] ss:$28 sps:$4 sm:$0xff]   ;;  %1999 = vmatprep.subr.bf16.mxu0 %v2895_v21  ;;  %v2910_v26 = vld [vmem:[%s3779_s12 + $0xac] ss:$28 sps:$4 sm:$0xff]   ;;  %v2957_v21 = vld [vmem:[%s3779_s12 + $0xf8] ss:$28 sps:$4 sm:$0xff]  }
 0x12d   : > { %v1139_v29 = vpop.f32.mrb[8].mxu0 }
 0x12e   : > { %v1140_v30 = vadd.f32 %v1139_v29, %v1099_v27  ;;  %v2676_v31 = vpop.f32.mrb[9].mxu0  ;;  %v2908_v27 = vld [vmem:[%s3779_s12 + $0xa8] ss:$28 sps:$4 sm:$0xff]   ;;  %v2914_v29 = vld [vmem:[%s3779_s12 + $0xe0] ss:$28 sps:$4 sm:$0xff]  }
 0x12f   : > { %v1142_v32 = vpop.f32.mrb[10].mxu0  ;;  %v2920_v31 = vld [vmem:[%s3779_s12 + $0x118] ss:$28 sps:$4 sm:$0xff]  }
 0x130   : > { %v1143_v33 = vadd.f32 %v1142_v32, %v1102_v28  ;;  %v2677_v34 = vpop.f32.mrb[11].mxu0  ;;  %v1146_v37 = vmax.f32 %v1140_v30, 0.0  ;;  %v2916_v28 = vld [vmem:[%s3779_s12 + $0xe4] ss:$28 sps:$4 sm:$0xff]   ;;  %v2922_v30 = vld [vmem:[%s3779_s12 + $0x11c] ss:$28 sps:$4 sm:$0xff]  }
 0x131   : > { %v2468_v32 = vld [vmem:[%s3776_s9] ss:$0 sm:$0xff] }
 0x132   : > { %v1147_v39 = vmax.f32 %v1143_v33, 0.0 }
 0x134   : > { %v1164_v40 = vpack.c.bf16 %v1147_v39, %v1146_v37 }
 0x136   : > { %2695 = vmatmul.mubr.bf16.vlgmr.msra.gmra.mrb[4].mxu1 %v1164_v40  ;;  %v2893_v40 = vld [vmem:[%s3779_s12 + $0x8] ss:$28 sps:$4 sm:$0xff]  }
 0x137   : > { %2757 = vmatpush3.bf16.msra.mxu1 %v2754_v3 }
 0x138   : > { %2759 = vmatprep.subr.bf16.mxu1 %v2758_v41 }
 0x13b   : > { %2761 = vmatpush3.bf16.msra.mxu1 %v2758_v41 }
 0x13c   : > { %2763 = vmatprep.subr.bf16.mxu1 %v2762_v44 }
 0x13f   : > { %2765 = vmatpush3.bf16.msra.mxu1 %v2762_v44  ;;  %v2907_v44 = vld [vmem:[%s3779_s12 + $0x7c] ss:$28 sps:$4 sm:$0xff]  }
 0x140   : > { %2767 = vmatprep.subr.bf16.mxu1 %v2766_v47 }
 0x143   : > { %2769 = vmatpush3.bf16.msra.mxu1 %v2766_v47  ;;  %v2911_v47 = vld [vmem:[%s3779_s12 + $0xb0] ss:$28 sps:$4 sm:$0xff]  }
 0x144   : > { %2717 = vmatprep.subr.mxu1 %v1388_v4 }
 0x209   : > { %v1254_v51 = vpop.f32.mrb[4].mxu1 }
 0x20a   : > { %v1255_v52 = vadd.f32 %v2456_v50, %v1254_v51  ;;  %v2696_v53 = vpop.f32.mrb[5].mxu1  ;;  %v2923_v51 = vld [vmem:[%s3779_s12 + $0x120] ss:$28 sps:$4 sm:$0xff]  }
 0x20b   : > { %v1257_v54 = vpop.f32.mrb[6].mxu1  ;;  %v2931_v53 = vld [vmem:[%s3779_s12 + $0x15c] ss:$28 sps:$4 sm:$0xff]  }
 0x20c   : > { %v1261_v55 = vmax.f32 %v1255_v52, 0.0  ;;  %v1258_v56 = vadd.f32 %v2456_v50, %v1257_v54  ;;  %v2697_v57 = vpop.f32.mrb[7].mxu1  ;;  %v2925_v50 = vld [vmem:[%s3779_s12 + $0x124] ss:$28 sps:$4 sm:$0xff]   ;;  %v2928_v52 = vld [vmem:[%s3779_s12 + $0x154] ss:$28 sps:$4 sm:$0xff]  }
 0x20d   : > { %v2926_v54 = vld [vmem:[%s3779_s12 + $0x150] ss:$28 sps:$4 sm:$0xff]  }
 0x20e   : > { %v1262_v58 = vmax.f32 %v1258_v56, 0.0  ;;  %2714 = vmatprep.mubr.msk.f32.mxu1 %vm1278_vm2, %v1261_v55  ;;  %v2929_v55 = vld [vmem:[%s3779_s12 + $0x158] ss:$28 sps:$4 sm:$0xff]   ;;  %v2934_v56 = vld [vmem:[%s3779_s12 + $0x18c] ss:$28 sps:$4 sm:$0xff]  }
 0x20f   : > { %v2937_v57 = vld [vmem:[%s3779_s12 + $0x194] ss:$28 sps:$4 sm:$0xff]  }
 0x210   : > { %2715 = vmatmul.mubr.msk.f32.vlgmr.msra.gmra.mrb[8].mxu1 %vm1278_vm2, %v1262_v58  ;;  %v2932_v58 = vld [vmem:[%s3779_s12 + $0x188] ss:$28 sps:$4 sm:$0xff]  }
 0x211   : > { %2718 = vmatpush3.msra.mxu1 %v1388_v4 }
 0x212   : > { %1956 = vmatprep.subr.bf16.mxu1 %v2892_v20  ;;  %v2954_v20 = vld [vmem:[%s3779_s12 + $0xf0] ss:$28 sps:$4 sm:$0xff]  }
 0x2e3   : > { %v2716_v60 = vpop.f32.mrb[8].mxu1 }
 0x2e4   : > { %v1357_v61 = vadd.f32 %v2716_v60, %v2465_v59  ;;  %v1351_v62 = vpop.f32.mrb[9].mxu1  ;;  %v2940_v60 = vld [vmem:[%s3779_s12 + $0x14] ss:$28 sps:$4 sm:$0xff]  }
 0x2e5   : > { %v1352_v63 = vadd.f32 %v2465_v59, %v1351_v62  ;;  %v2935_v59 = vld [vmem:[%s3779_s12 + $0x190] ss:$28 sps:$4 sm:$0xff]   ;;  %v2471_v62 = vld [vmem:[%s3778_s11] ss:$0 sm:$0xff] }
 0x2e6   : > { %v1361_v0 = vmul.f32 0.5, %v1357_v61  ;;  %2264 = vst.msk [vmem:[%s533_s25 + $0x8] sm:$0xff] %vm978_vm1, %v1357_v61 }
 0x2e7   : > { %v1360_v1 = vmul.f32 0.5, %v1352_v63  ;;  %2263 = vst.msk [vmem:[%s533_s25] sm:$0xff] %vm978_vm1, %v1352_v63  ;;  %s3705_s25 = scalar_lea.vmem [#allocation2], %s2770_s17 }
 0x2e8   : > { %v1364_v2 = vmul.f32 1.442695, %v1361_v0  ;;  %s2285_s24 = sshll.u32 %s3705_s25, 4  ;;  %s3720_s24 = int_to_ptr.vmem [resolvable:$true] %s2285_s24 }
 0x2e9   : > { %v1362_v3 = vmul.f32 1.442695, %v1360_v1  ;;  %s3030_s23 = scalar_lea.vmem %s3720_s24, 896 }
 0x2ea   : > { %p3031_p11 = scmp.ne.s32.totalorder %s3720_s24, %s3030_s23 }
 0x2eb   : > { %2970 = vpow2.f32 %v1362_v3 }
 0x2ec   : > { %2972 = vpow2.f32 %v1364_v2  ;;  %p3032_p12 = pnand %p3031_p11, %p3220_p5 }
 0x2ee   : > { %p3033_p13 = pneg %p3032_p12 }
 0x2f5   : > { %v2971_v8 = vpop.eup %2970 }
 0x2f6   : > { %v1376_v9 = vmul.f32 %v2971_v8, %v1371_v5  ;;  %v2973_v10 = vpop.eup %2972  ;;  %v2941_v8 = vld [vmem:[%s3779_s12 + $0x18] ss:$28 sps:$4 sm:$0xff]  }
 0x2f7   : > { %v1377_v12 = vmul.f32 %v2973_v10, %v1373_v11  ;;  %v2944_v10 = vld [vmem:[%s3779_s12 + $0x4c] ss:$28 sps:$4 sm:$0xff]  }
 0x2f8   : > { %1380 = vrot.lane.b32.xlu1 %v1376_v9, %s3097_s26  ;;  %v2942_v11 = vld [vmem:[%s3779_s12 + $0x48] ss:$28 sps:$4 sm:$0xff]  }
 0x2fc   : > { %1382 = vrot.lane.b32.xlu1 %v1377_v12, %s3097_s26  ;;  %v2945_v12 = vld [vmem:[%s3779_s12 + $0x50] ss:$28 sps:$4 sm:$0xff]   ;;  %s3099_s26 = smov [#allocation2]  }
 0x2fd   : > { %s3034_s29 = sshll.u32 %s3099_s26, 4  ;;  %s3035_s29 = int_to_ptr.vmem [resolvable:$false] %s3034_s29 }
 0x2fe   : > { %s3036_s30 = scalar_lea.vmem %s3035_s29, 1792  ;;  %p3037_p0 = scmp.lt.s32.totalorder %s3720_s24, %s3035_s29 }
 0x2ff   : > { %p3038_p1 = scmp.lt.s32.totalorder %s3036_s30, %s3030_s23 }
 0x301   : > { %p3039_p2 = por %p3038_p1, %p3037_p0 }
 0x303   : > { %p3040_p3 = pnand %p3039_p2, %p3033_p13 }
 0x36a   : > { %v1381_v13 = vpop.permute.xlu1 %1380 }
 0x36b   : > { %v1386_v14 = vadd.f32 %v1381_v13, %v1352_v63  ;;  %v2948_v13 = vld [vmem:[%s3779_s12 + $0x84] ss:$28 sps:$4 sm:$0xff]  }
 0x36d   : > { %2719 = vmatprep.mubr.msk.f32.mxu1 %vm1396_vm3, %v1386_v14  ;;  %v2946_v14 = vld [vmem:[%s3779_s12 + $0x80] ss:$28 sps:$4 sm:$0xff]  }
 0x36e   : > { %v1383_v15 = vpop.permute.xlu1 %1382 }
 0x36f   : > { %v1387_v16 = vadd.f32 %v1383_v15, %v1357_v61  ;;  %v3098_v61 = vmov 0   ;;  %v2949_v15 = vld [vmem:[%s3779_s12 + $0x88] ss:$28 sps:$4 sm:$0xff]  }
 0x371   : > { %2720 = vmatmul.mubr.msk.f32.vlgmr.msra.gmra.mrb[10].mxu1 %vm1396_vm3, %v1387_v16  ;;  %v2952_v16 = vld [vmem:[%s3779_s12 + $0xbc] ss:$28 sps:$4 sm:$0xff]  }
 0x372   : > { %1957 = vmatpush1.bf16.msra.mxu1 %v2890_v19  ;;  %1988 = vmatprep.mubr.bf16.mxu1 %v3098_v61  ;;  %v2956_v19 = vld [vmem:[%s3779_s12 + $0xf4] ss:$28 sps:$4 sm:$0xff]  }
 0x373   : > { %1958 = vmatprep.subr.bf16.mxu1 %v2898_v22  ;;  %v2960_v22 = vld [vmem:[%s3779_s12 + $0x12c] ss:$28 sps:$4 sm:$0xff]  }
 0x376   : > { %1959 = vmatpush1.bf16.msra.mxu1 %v2896_v23  ;;  %v2958_v23 = vld [vmem:[%s3779_s12 + $0x128] ss:$28 sps:$4 sm:$0xff]  }
 0x377   : > { %1960 = vmatprep.subr.bf16.mxu1 %v2904_v24  ;;  %v2961_v24 = vld [vmem:[%s3779_s12 + $0x130] ss:$28 sps:$4 sm:$0xff]  }
 0x37a   : > { %1961 = vmatpush1.bf16.msra.mxu1 %v2902_v25  ;;  %v2964_v25 = vld [vmem:[%s3779_s12 + $0x164] ss:$28 sps:$4 sm:$0xff]  }
 0x37b   : > { %1962 = vmatprep.subr.bf16.mxu1 %v2910_v26  ;;  %v2962_v26 = vld [vmem:[%s3779_s12 + $0x160] ss:$28 sps:$4 sm:$0xff]  }
 0x37e   : > { %1963 = vmatpush1.bf16.msra.mxu1 %v2908_v27  ;;  %v2965_v27 = vld [vmem:[%s3779_s12 + $0x168] ss:$28 sps:$4 sm:$0xff]  }
 0x37f   : > { %1964 = vmatprep.subr.bf16.mxu1 %v2916_v28  ;;  %v2968_v28 = vld [vmem:[%s3779_s12 + $0x19c] ss:$28 sps:$4 sm:$0xff]  }
 0x382   : > { %1965 = vmatpush1.bf16.msra.mxu1 %v2914_v29  ;;  %v2966_v29 = vld [vmem:[%s3779_s12 + $0x198] ss:$28 sps:$4 sm:$0xff]  }
 0x383   : > { %1966 = vmatprep.subr.bf16.mxu1 %v2922_v30  ;;  %v2969_v30 = vld [vmem:[%s3779_s12 + $0x1a0] ss:$28 sps:$4 sm:$0xff]  }
 0x386   : > { %1967 = vmatpush1.bf16.msra.mxu1 %v2920_v31  ;;  %v1633_v31 = vlaneseq }
 0x387   : > { %1968 = vmatprep.subr.bf16.mxu1 %v2928_v52 }
 0x38a   : > { %1969 = vmatpush1.bf16.msra.mxu1 %v2926_v54 }
 0x38b   : > { %1970 = vmatprep.subr.bf16.mxu1 %v2934_v56 }
 0x38e   : > { %1971 = vmatpush1.bf16.msra.mxu1 %v2932_v58 }
 0x38f   : > { %2042 = vmatprep.subr.bf16.mxu1 %v2940_v60 }
 0x444   : > { %v2721_v33 = vpop.f32.mrb[10].mxu1 }
 0x445   : > { %v1475_v34 = vadd.f32 %v2721_v33, %v2468_v32  ;;  %v1469_v35 = vpop.f32.mrb[11].mxu1 }
 0x446   : > { %v1470_v36 = vadd.f32 %v2468_v32, %v1469_v35  ;;  %v3681_v32 = vshrl.u32 %v1633_v31, 7  ;;  %v3688_v35 = vld [vmem:[%s3780_s13] sm:$0x7f] }
 0x447   : > { %v1479_v37 = vmax.f32 %v1475_v34, 0.0 }
 0x448   : > { %v1478_v39 = vmax.f32 %v1470_v36, 0.0  ;;  %v1635_v33 = vsub.s32 0, %v3681_v32  ;;  %v1643_v34 = vsub.s32 2, %v3681_v32  ;;  %v1639_v36 = vsub.s32 1, %v3681_v32 }
 0x44a   : > { %v1488_v41 = vpack.c.bf16 %v1479_v37, %v1478_v39  ;;  %v1636_v37 = vrot.slane %v3688_v35, %v1635_v33  ;;  %v1644_v39 = vrot.slane %v3688_v35, %v1643_v34 }
 0x44c   : > { %2731 = vmatmul.mubr.msk.bf16.vlgmr.msra.gmra.mrb[12].mxu0 %vm1278_vm2, %v1488_v41 }
 0x44d   : > { %2000 = vmatpush1.bf16.msra.mxu0 %v2893_v40  ;;  %2031 = vmatprep.mubr.bf16.mxu0 %v3098_v61  ;;  %v1640_v40 = vrot.slane %v3688_v35, %v1639_v36 }
 0x44e   : > { %2001 = vmatprep.subr.bf16.mxu0 %v2901_v42 }
 0x451   : > { %2002 = vmatpush1.bf16.msra.mxu0 %v2899_v43 }
 0x452   : > { %2003 = vmatprep.subr.bf16.mxu0 %v2907_v44 }
 0x455   : > { %2004 = vmatpush1.bf16.msra.mxu0 %v2905_v45 }
 0x456   : > { %2005 = vmatprep.subr.bf16.mxu0 %v2913_v46 }
 0x459   : > { %2006 = vmatpush1.bf16.msra.mxu0 %v2911_v47 }
 0x45a   : > { %2007 = vmatprep.subr.bf16.mxu0 %v2919_v48 }
 0x45d   : > { %2008 = vmatpush1.bf16.msra.mxu0 %v2917_v49 }
 0x45e   : > { %2009 = vmatprep.subr.bf16.mxu0 %v2925_v50 }
 0x461   : > { %2010 = vmatpush1.bf16.msra.mxu0 %v2923_v51 }
 0x462   : > { %2011 = vmatprep.subr.bf16.mxu0 %v2931_v53 }
 0x465   : > { %2012 = vmatpush1.bf16.msra.mxu0 %v2929_v55 }
 0x466   : > { %2013 = vmatprep.subr.bf16.mxu0 %v2937_v57 }
 0x469   : > { %2014 = vmatpush1.bf16.msra.mxu0 %v2935_v59 }
 0x46a   : > { %2734 = vmatprep.subr.bf16.mxu0 %v3094_v38 }
 0x51f   : > { %v1557_v63 = vpop.f32.mrb[12].mxu0 }
 0x520   : > { %v1558_v0 = vadd.f32 %v2471_v62, %v1557_v63  ;;  %v2732_v1 = vpop.f32.mrb[13].mxu0 }
 0x521   : > { %v1560_v2 = vpop.f32.mrb[14].mxu0 }
 0x522   : > { %v1561_v3 = vadd.f32 %v2471_v62, %v1560_v2  ;;  %v2733_v4 = vpop.f32.mrb[15].mxu0  ;;  %v1564_v5 = vmax.f32 %v1558_v0, 0.0 }
 0x524   : > { %v1565_v6 = vmax.f32 %v1561_v3, 0.0 }
 0x526   : > { %v1630_v9 = vpack.c.bf16 %v1565_v6, %v1564_v5 }
 0x528   : > { %1989 = vmatmul.mubr.bf16.vlgmr.msra.gmra.mrb[12].mxu1 %v1630_v9  ;;  %2032 = vmatmul.mubr.bf16.vlgmr.msra.gmra.mrb[16].mxu0 %v1630_v9 }
 0x529   : > { %2043 = vmatpush1.bf16.msra.mxu1 %v2938_v7  ;;  %2735 = vmatpush3.bf16.msra.mxu0 %v2941_v8 }
 0x52a   : > { %2044 = vmatprep.subr.bf16.mxu1 %v2944_v10  ;;  %2736 = vmatprep.subr.bf16.mxu0 %v3094_v38 }
 0x52b   : > { %2074 = vmatprep.mubr.bf16.mxu1 %v3098_v61  ;;  %2750 = vmatprep.mubr.msk.bf16.mxu0 %vm3095_vm0, %v3094_v38 }
 0x52d   : > { %2045 = vmatpush1.bf16.msra.mxu1 %v2942_v11  ;;  %2737 = vmatpush3.bf16.msra.mxu0 %v2945_v12 }
 0x52e   : > { %2046 = vmatprep.subr.bf16.mxu1 %v2948_v13  ;;  %2738 = vmatprep.subr.bf16.mxu0 %v3094_v38 }
 0x531   : > { %2047 = vmatpush1.bf16.msra.mxu1 %v2946_v14  ;;  %2739 = vmatpush3.bf16.msra.mxu0 %v2949_v15 }
 0x532   : > { %2048 = vmatprep.subr.bf16.mxu1 %v2952_v16  ;;  %2740 = vmatprep.subr.bf16.mxu0 %v3094_v38 }
 0x535   : > { %2049 = vmatpush1.bf16.msra.mxu1 %v2950_v17  ;;  %2741 = vmatpush3.bf16.msra.mxu0 %v2953_v18  ;;  %v1651_v18 = vsub.s32 4, %v3681_v32 }
 0x536   : > { %2050 = vmatprep.subr.bf16.mxu1 %v2956_v19  ;;  %2742 = vmatprep.subr.bf16.mxu0 %v3094_v38  ;;  %v1659_v19 = vsub.s32 6, %v3681_v32 }
 0x539   : > { %2051 = vmatpush1.bf16.msra.mxu1 %v2954_v20  ;;  %2743 = vmatpush3.bf16.msra.mxu0 %v2957_v21  ;;  %v1655_v20 = vsub.s32 5, %v3681_v32 }
 0x53a   : > { %2052 = vmatprep.subr.bf16.mxu1 %v2960_v22  ;;  %2744 = vmatprep.subr.bf16.mxu0 %v3094_v38 }
 0x53d   : > { %2053 = vmatpush1.bf16.msra.mxu1 %v2958_v23  ;;  %2745 = vmatpush3.bf16.msra.mxu0 %v2961_v24  ;;  %v1652_v23 = vrot.slane %v3688_v35, %v1651_v18  ;;  %v1660_v24 = vrot.slane %v3688_v35, %v1659_v19 }
 0x53e   : > { %2054 = vmatprep.subr.bf16.mxu1 %v2964_v25  ;;  %2746 = vmatprep.subr.bf16.mxu0 %v3094_v38 }
 0x541   : > { %2055 = vmatpush1.bf16.msra.mxu1 %v2962_v26  ;;  %2747 = vmatpush3.bf16.msra.mxu0 %v2965_v27  ;;  %v1656_v26 = vrot.slane %v3688_v35, %v1655_v20 }
 0x542   : > { %2056 = vmatprep.subr.bf16.mxu1 %v2968_v28  ;;  %2748 = vmatprep.subr.bf16.mxu0 %v3094_v38  ;;  %v1647_v38 = vsub.s32 3, %v3681_v32 }
 0x544   : > { %v1648_v41 = vrot.slane %v3688_v35, %v1647_v38 }
 0x545   : > { %2057 = vmatpush1.bf16.msra.mxu1 %v2966_v29  ;;  %2749 = vmatpush3.bf16.msra.mxu0 %v2969_v30 }
 0x548   : > { %2075 = vmatmul.mubr.bf16.vlgmr.msra.gmra.mrb[16].mxu1 %v1630_v9  ;;  %2751 = vmatmul.mubr.bf16.vlgmr.msra.gmra.mrb[20].mxu0 %v1630_v9 }
 0x5fb   : > { %v1990_v42 = vpop.f32.mrb[12].mxu1  ;;  %v2033_v43 = vpop.f32.mrb[16].mxu0 }
 0x5fc   : > { %v1991_v44 = vadd.f32 %v1990_v42, %v1636_v37  ;;  %v2034_v45 = vadd.f32 %v2033_v43, %v1644_v39  ;;  %v1992_v46 = vpop.f32.mrb[13].mxu1  ;;  %v2035_v47 = vpop.f32.mrb[17].mxu0 }
 0x5fd   : > { %v1993_v48 = vadd.f32 %v1992_v46, %v1640_v40  ;;  %v2036_v49 = vadd.f32 %v2035_v47, %v1648_v41  ;;  %v1994_v50 = vpop.f32.mrb[14].mxu1  ;;  %v2037_v51 = vpop.f32.mrb[18].mxu0 }
 0x5fe   : > { %v2533_v52 = vmul.f32 -1.442695, %v1991_v44  ;;  %v2535_v53 = vmul.f32 -1.442695, %v2034_v45  ;;  %v1995_v54 = vadd.f32 %v1994_v50, %v1636_v37  ;;  %v2038_v55 = vadd.f32 %v2037_v51, %v1644_v39  ;;  %v1996_v56 = vpop.f32.mrb[15].mxu1  ;;  %v2039_v57 = vpop.f32.mrb[19].mxu0 }
 0x5ff   : > { %v2534_v58 = vmul.f32 -1.442695, %v1993_v48  ;;  %v2536_v59 = vmul.f32 -1.442695, %v2036_v49  ;;  %v1997_v60 = vadd.f32 %v1996_v56, %v1640_v40  ;;  %v2040_v61 = vadd.f32 %v2039_v57, %v1648_v41 }
 0x600   : > { %2974 = vpow2.f32 %v2533_v52  ;;  %v2540_v62 = vmul.f32 -1.442695, %v1995_v54  ;;  %v2542_v63 = vmul.f32 -1.442695, %v2038_v55 }
 0x601   : > { %2976 = vpow2.f32 %v2535_v53  ;;  %v2541_v0 = vmul.f32 -1.442695, %v1997_v60  ;;  %v2543_v1 = vmul.f32 -1.442695, %v2040_v61 }
 0x602   : > { %2978 = vpow2.f32 %v2534_v58 }
 0x603   : > { %2980 = vpow2.f32 %v2536_v59 }
 0x604   : > { %2982 = vpow2.f32 %v2540_v62 }
 0x605   : > { %2984 = vpow2.f32 %v2542_v63 }
 0x606   : > { %2986 = vpow2.f32 %v2541_v0 }
 0x607   : > { %2988 = vpow2.f32 %v2543_v1 }
 0x60a   : > { %v2975_v2 = vpop.eup %2974 }
 0x60b   : > { %v2977_v3 = vpop.eup %2976  ;;  %v2168_v4 = vadd.f32 1.0, %v2975_v2 }
 0x60c   : > { %v2979_v5 = vpop.eup %2978  ;;  %v2170_v6 = vadd.f32 1.0, %v2977_v3 }
 0x60d   : > { %v2981_v7 = vpop.eup %2980  ;;  %2990 = vrcp.f32 %v2168_v4  ;;  %v2169_v8 = vadd.f32 1.0, %v2979_v5 }
 0x60e   : > { %v2983_v9 = vpop.eup %2982  ;;  %2992 = vrcp.f32 %v2170_v6  ;;  %v2171_v10 = vadd.f32 1.0, %v2981_v7 }
 0x60f   : > { %v2985_v11 = vpop.eup %2984  ;;  %2994 = vrcp.f32 %v2169_v8  ;;  %v2175_v12 = vadd.f32 1.0, %v2983_v9 }
 0x610   : > { %v2987_v13 = vpop.eup %2986  ;;  %2996 = vrcp.f32 %v2171_v10  ;;  %v2177_v14 = vadd.f32 1.0, %v2985_v11 }
 0x611   : > { %v2989_v15 = vpop.eup %2988  ;;  %2998 = vrcp.f32 %v2175_v12  ;;  %v2176_v16 = vadd.f32 1.0, %v2987_v13 }
 0x612   : > { %3000 = vrcp.f32 %v2177_v14  ;;  %v2178_v17 = vadd.f32 1.0, %v2989_v15 }
 0x613   : > { %3002 = vrcp.f32 %v2176_v16 }
 0x614   : > { %3004 = vrcp.f32 %v2178_v17 }
 0x617   : > { %v2991_v21 = vpop.eup %2990 }
 0x618   : > { %v2993_v22 = vpop.eup %2992 }
 0x619   : > { %v2995_v25 = vpop.eup %2994 }
 0x61a   : > { %v2997_v27 = vpop.eup %2996  ;;  %v2560_v28 = vpack.c.bf16 %v2995_v25, %v2991_v21 }
 0x61b   : > { %v2999_v29 = vpop.eup %2998  ;;  %v2561_v30 = vpack.c.bf16 %v2997_v27, %v2993_v22  ;;  %v2076_v31 = vpop.f32.mrb[16].mxu1 }
 0x61c   : > { %v2119_v33 = vpop.f32.mrb[20].mxu0  ;;  %v3001_v34 = vpop.eup %3000  ;;  %2254 = vst [vmem:[%s3705_s25] sm:$0xff] %v2560_v28  ;;  %v2077_v32 = vadd.f32 %v2076_v31, %v1652_v23 }
 0x61d   : > { %v2120_v36 = vadd.f32 %v2119_v33, %v1660_v24  ;;  %v2078_v38 = vpop.f32.mrb[17].mxu1  ;;  %v2752_v37 = vpop.f32.mrb[21].mxu0  ;;  %2255 = vst [vmem:[%s3705_s25 + $0x8] sm:$0xff] %v2561_v30 }
 0x61e   : > { %v3003_v39 = vpop.eup %3002  ;;  %v2079_v35 = vadd.f32 %v2078_v38, %v1656_v26  ;;  %v2080_v40 = vpop.f32.mrb[18].mxu1  ;;  %v2537_v44 = vmul.f32 -1.442695, %v2077_v32 }
 0x61f   : > { %v2122_v41 = vpop.f32.mrb[22].mxu0  ;;  %v3005_v42 = vpop.eup %3004  ;;  %v2564_v43 = vpack.c.bf16 %v3003_v39, %v2999_v29  ;;  %v2539_v45 = vmul.f32 -1.442695, %v2120_v36  ;;  %v2081_v46 = vadd.f32 %v2080_v40, %v1652_v23 }
 0x620   : > { %v2082_v47 = vpop.f32.mrb[19].mxu1  ;;  %v2753_v48 = vpop.f32.mrb[23].mxu0  ;;  %v2565_v49 = vpack.c.bf16 %v3005_v42, %v3001_v34  ;;  %v2538_v50 = vmul.f32 -1.442695, %v2079_v35  ;;  %v2123_v51 = vadd.f32 %v2122_v41, %v1660_v24  ;;  %3006 = vpow2.f32 %v2537_v44 }
 0x621   : > { %v2083_v52 = vadd.f32 %v2082_v47, %v1656_v26  ;;  %2259 = vst [vmem:[%s3705_s25 + $0x1c] sm:$0xff] %v2564_v43  ;;  %v2544_v53 = vmul.f32 -1.442695, %v2081_v46  ;;  %3008 = vpow2.f32 %v2539_v45 }
 0x622   : > { %2260 = vst [vmem:[%s3705_s25 + $0x24] sm:$0xff] %v2565_v49  ;;  %v2546_v54 = vmul.f32 -1.442695, %v2123_v51  ;;  %3010 = vpow2.f32 %v2538_v50 }
 0x623   : > { %v2545_v55 = vmul.f32 -1.442695, %v2083_v52  ;;  %3012 = vpow2.f32 %v2544_v53 }
 0x624   : > { %3014 = vpow2.f32 %v2546_v54 }
 0x625   : > { %3016 = vpow2.f32 %v2545_v55 }
 0x62a   : > { %v3007_v56 = vpop.eup %3006 }
 0x62b   : > { %v3009_v57 = vpop.eup %3008  ;;  %v2172_v58 = vadd.f32 1.0, %v3007_v56 }
 0x62c   : > { %v3011_v59 = vpop.eup %3010  ;;  %v2174_v60 = vadd.f32 1.0, %v3009_v57 }
 0x62d   : > { %v3013_v61 = vpop.eup %3012  ;;  %3018 = vrcp.f32 %v2172_v58  ;;  %v2173_v62 = vadd.f32 1.0, %v3011_v59 }
 0x62e   : > { %v3015_v63 = vpop.eup %3014  ;;  %3020 = vrcp.f32 %v2174_v60  ;;  %v2179_v0 = vadd.f32 1.0, %v3013_v61 }
 0x62f   : > { %v3017_v1 = vpop.eup %3016  ;;  %3022 = vrcp.f32 %v2173_v62  ;;  %v2181_v2 = vadd.f32 1.0, %v3015_v63 }
 0x630   : > { %3024 = vrcp.f32 %v2179_v0  ;;  %v2180_v3 = vadd.f32 1.0, %v3017_v1 }
 0x631   : > { %3026 = vrcp.f32 %v2181_v2 }
 0x632   : > { %3028 = vrcp.f32 %v2180_v3 }
 0x637   : > { %v3019_v4 = vpop.eup %3018 }
 0x638   : > { %v3021_v5 = vpop.eup %3020 }
 0x639   : > { %v3023_v6 = vpop.eup %3022  ;;  %v2563_v7 = vpack.c.bf16 %v3021_v5, %v3021_v5 }
 0x63a   : > { %v3025_v8 = vpop.eup %3024  ;;  %v2562_v9 = vpack.c.bf16 %v3023_v6, %v3019_v4 }
 0x63b   : > { %v3027_v10 = vpop.eup %3026  ;;  %2258 = vst.msk [vmem:[%s3705_s25 + $0x18] sm:$0xf] %vm2257_vm4, %v2563_v7 }
 0x63c   : > { %v3029_v11 = vpop.eup %3028  ;;  %2256 = vst [vmem:[%s3705_s25 + $0x10] sm:$0xff] %v2562_v9  ;;  %v2567_v12 = vpack.c.bf16 %v3027_v10, %v3027_v10 }
 0x63d   : > { %v2566_v13 = vpack.c.bf16 %v3029_v11, %v3025_v8 }
 0x63e   : > { %2262 = vst.msk [vmem:[%s3705_s25 + $0x34] sm:$0xf] %vm2257_vm4, %v2567_v12 }
 0x63f   : > { %2261 = vst [vmem:[%s3705_s25 + $0x2c] sm:$0xff] %v2566_v13 }
 0x640   : > { %3043 = shalt.err (!%p3040_p3)
}
 0x641   : > { %s3044_s16 = scalar_lea.hbm %s3718_s21, 896  ;;  %s3048_s27 = scalar_lea.hbm %s3781_s14, 1792 }
 0x642   : > { %p3045_p4 = scmp.ne.s32.totalorder %s3718_s21, %s3044_s16  ;;  %p3049_p9 = scmp.lt.u32.totalorder %s3718_s21, %s3781_s14 }
 0x643   : > { %p3050_p10 = scmp.lt.u32.totalorder %s3048_s27, %s3044_s16  ;;  %p3052_p12 = scmp.lt.u32.totalorder %s3044_s16, %s3718_s21 }
 0x644   : > { %p3046_p7 = pnand %p3045_p4, %p3220_p5 }
 0x645   : > { %p3051_p11 = por %p3050_p10, %p3049_p9 }
 0x646   : > { %p3047_p8 = pneg %p3046_p7 }
 0x647   : > { %p3053_p13 = por %p3052_p12, %p3051_p11 }
 0x649   : > { %p3054_p0 = pnand %p3053_p13, %p3047_p8 }
 0x64b   : > { %3057 = shalt.err (!%p3054_p0)
}
 0x64c   : > { %s3100_s23 = smov 448   ;;  %s3101_s26 = smov 28  }
 0x64d   : > { %2773 = dma.vmem_to_hbm [thread:$0]  (%p3220_p5), %s3720_s24, 896, %s3718_s21, %s3726_s22, %s3100_s23, %s3100_s23, %s3101_s26  }
 0x64e PF: > { %s3797_s29 = sld [smem:[#allocation7_spill]]  ;;  %s3798_s30 = sld [smem:[#allocation5_spill]] }
 0x654   : > { %p2779_p1 = scmp.ge.s32.totalorder %s3797_s29, 2  ;;  %s2304_s25 = sand.u32 1, %s3798_s30  }
 0x655   : > { %s2305_s16 = scalar_lea.sflag [#allocation3], %s2304_s25 }
 0x656   : > { %p2776_p2 = pnand %p2779_p1, %p3224_p6 }
 0x658   : > { %3075 = dma.done.wait (!%p2776_p2), %s2305_s16, 896  }
 0x659   : > { %3077 = vsyncadd (!%p2776_p2), %s2305_s16, 4294966400  ;;  %s3800_s21 = sld [smem:[#allocation8_spill]]  ;;  %s3801_s27 = sld [smem:[#allocation6_spill]] }
 0x65a   : > { %s3802_s20 = sld [smem:[#allocation9_spill]]  ;;  %s3803_s18 = smov %s3084_s19 }
 0x65f   : > { %p26_p3 = scmp.ge.s32.totalorder %s3800_s21, 4   ;;  %s3804_s19 = smov %s3801_s27 }
 0x661   :  { %28 = sbr.rel (!%p26_p3) target bundleno = 3 (0x3), region = 126 }
 0x668   :  { %2318 = vsyncpa [#allocation3], 1 }
 0x669   :  { %2320 = vsyncpa [#allocation3 + $0x1], 1 }

</bundles_post_ra>
